<compile_context>
chip_gen: v6e
topology: v6e:2x2x1
jax: 0.10.0
libtpu: 0.0.40
codegen_flags: <defaults>
</compile_context>

<pallas_src>
import functools

import jax
import jax.numpy as jnp
from jax.experimental import pallas as pl
from jax.experimental.pallas import tpu as pltpu


# ----------------------------------------------------------------------------
# Kernels
# ----------------------------------------------------------------------------
def _bpff_kernel(blist_ref, run_ref, x_ref, bseq_ref,
                 w1_ref, b1_ref, w2_ref, b2_ref,
                 o_ref, acc_ref, yacc_ref, *, n_b):
    """Behavior-specific PFF over behavior-sorted rows.

    grid = (row_tiles, n_b, f_tiles).  Step (i, k, f) runs the FFN of behavior
    blist[i*n_b + k] on row tile i (accumulating over d_ff slabs in f32 scratch)
    iff run[i*n_b + k] != 0.  Rows are sorted by behavior, so most tiles have a
    single present behavior; absent slots skip compute (pl.when) and their
    weight DMAs (index_map repeats the previous block index).  Each row matches
    exactly one behavior, so results accumulate into yacc and the output tile
    is written once at the last (k, f) step.
    """
    i = pl.program_id(0)
    k = pl.program_id(1)
    f = pl.program_id(2)
    nk = pl.num_programs(1)
    nf = pl.num_programs(2)

    # Zero the per-tile output accumulator exactly once per row tile.
    @pl.when((k == 0) & (f == 0))
    def _():
        yacc_ref[...] = jnp.zeros_like(yacc_ref)

    # Run this behavior's FFN only if it is (newly) present in the row tile.
    @pl.when(run_ref[i * n_b + k] != 0)
    def _():
        @pl.when(f == 0)
        def _():
            acc_ref[...] = jnp.zeros_like(acc_ref)

        h = jnp.dot(x_ref[...], w1_ref[...],
                    preferred_element_type=jnp.float32) + b1_ref[...]
        h = jnp.maximum(h, 0.0)                                       # ReLU
        acc_ref[...] += jnp.dot(h.astype(w2_ref.dtype), w2_ref[...],
                                preferred_element_type=jnp.float32)

        @pl.when(f == nf - 1)
        def _():
            kb = blist_ref[i * n_b + k]                               # 0-based behavior id
            mask = bseq_ref[...] == (kb + 1)                          # (tile_n, 1); 0 == padding
            yacc_ref[...] += jnp.where(mask, acc_ref[...] + b2_ref[...], 0.0)

    # Single, unconditional, lane-dense output store per row tile.
    @pl.when((k == nk - 1) & (f == nf - 1))
    def _():
        o_ref[...] = yacc_ref[...].astype(o_ref.dtype)


def _pff_kernel(x_ref, w1_ref, b1_ref, w2_ref, b2_ref, o_ref, acc_ref):
    """Single shared PFF: w2(relu(w1(x) + b1)) + b2, accumulated over d_ff slabs."""
    f = pl.program_id(1)
    nf = pl.num_programs(1)

    @pl.when(f == 0)
    def _():
        acc_ref[...] = jnp.zeros_like(acc_ref)

    h = jnp.dot(x_ref[...], w1_ref[...],
                preferred_element_type=jnp.float32) + b1_ref[...]
    h = jnp.maximum(h, 0.0)
    acc_ref[...] += jnp.dot(h.astype(w2_ref.dtype), w2_ref[...],
                            preferred_element_type=jnp.float32)

    @pl.when(f == nf - 1)
    def _():
        o_ref[...] = (acc_ref[...] + b2_ref[...]).astype(o_ref.dtype)


# ----------------------------------------------------------------------------
# Wrapper helpers
# ----------------------------------------------------------------------------
def _round_up(a, m):
    return ((a + m - 1) // m) * m


def _vmem_cap_bytes():
    """~3/4 of physical VMEM (Mosaic headroom): ~96 MiB v5e/v6e, ~48 MiB v7x."""
    try:
        cap = int(pltpu.get_tpu_info().vmem_capacity_bytes)
    except Exception:
        cap = 64 * 1024 * 1024                  # conservative (v7x-sized) fallback
    return (cap * 3) // 4


def _f_tile_candidates(F):
    cands = {F}
    c = 128
    while c < F:
        if F % c == 0:
            cands.add(c)
        c += 128
    return sorted(cands, reverse=True)          # descending


def _pick_f_tile(F, requested, weight_budget_bytes, H, itemsize):
    """Largest valid d_ff slab (divisor of F, multiple of 128, or F itself)."""
    cands = _f_tile_candidates(F)
    if requested is not None:                   # round to a valid size, keep footprint
        le = [c for c in cands if c <= requested]
        return le[0] if le else cands[-1]
    for c in cands:                             # prefer num_f == 1 when slabs fit VMEM
        if 4 * H * c * itemsize <= weight_budget_bytes:   # w1 + w2 slabs, double-buffered
            return c
    return cands[-1]


# ----------------------------------------------------------------------------
# Wrapper
# ----------------------------------------------------------------------------
def behavior_specific_pff(x, b_seq, params, *, bpff, n_b,
                          tile_n=512, f_tile=None, compute_dtype=jnp.bfloat16):
    """Forward pass of BehaviorSpecificPFF (dropout = identity / eval mode).

    x:       (B, T, H)
    b_seq:   (B, T) int, 0 = padding (used only when bpff and n_b > 1)
    params:  (w1, b1, w2, b2) stacked over behaviors, pre-transposed vs nn.Linear:
             w1 (n_b, H, F), b1 (n_b, 1, F), w2 (n_b, F, H), b2 (n_b, 1, H)
    compute_dtype: matmul input dtype (default bf16); accumulation stays f32.
    """
    B, T, H = x.shape
    N = B * T
    w1, b1, w2, b2 = params
    F = w1.shape[2]

    out_dtype = x.dtype
    if compute_dtype is None:
        compute_dtype = x.dtype
    csz = jnp.dtype(compute_dtype).itemsize
    osz = jnp.dtype(out_dtype).itemsize

    cap = _vmem_cap_bytes()

    # Row tile: large for MXU occupancy / weight-stream amortization, clamped
    # to the (8-rounded) token count.
    tile_n = _round_up(min(int(tile_n), _round_up(N, 8)), 8)
    Np = _round_up(N, tile_n)
    num_tiles = Np // tile_n

    # d_ff slab: as large as the VMEM budget allows (num_f == 1 preferred).
    fixed = (2 * tile_n * H * (csz + osz)       # double-buffered x / out tiles
             + 2 * tile_n * H * 4               # f32 acc + yacc scratch
             + 2 * tile_n * 4 + 2 * H * 4)      # b_seq tile, b2
    weight_budget = max(cap - fixed - (8 << 20), 4 * H * 128 * csz)
    f_tile_eff = _pick_f_tile(F, f_tile, weight_budget, H, csz)
    num_f = F // f_tile_eff

    vmem_limit = int(cap)

    xf = x.reshape(N, H)
    w1c = w1.astype(compute_dtype)
    w2c = w2.astype(compute_dtype)
    b1f = b1.astype(jnp.float32)
    b2f = b2.astype(jnp.float32)

    if bpff and n_b > 1:
        bs = b_seq.reshape(N).astype(jnp.int32)
        if Np != N:
            xf = jnp.pad(xf, ((0, Np - N), (0, 0)))
            bs = jnp.pad(bs, ((0, Np - N),))            # pad value 0 == padding token

        # --- group tokens by behavior (MoE grouped-matmul pattern) ----------
        order = jnp.argsort(bs)                          # padding first, then 1..n_b
        inv = jnp.argsort(order)
        xs = jnp.take(xf, order, axis=0).astype(compute_dtype)
        bss = jnp.take(bs, order)

        # Per-tile compacted behavior list + run bitmap (scalar-prefetched).
        tiles = bss.reshape(num_tiles, tile_n)
        present = (tiles[:, :, None] == jnp.arange(1, n_b + 1)[None, None, :]).any(axis=1)
        count = present.sum(axis=1).astype(jnp.int32)                     # (num_tiles,)
        rank = jnp.cumsum(present, axis=1) - 1                            # (num_tiles, n_b)
        sel = (present[:, :, None]
               & (rank[:, :, None] == jnp.arange(n_b)[None, None, :]))    # (tiles, j, slot)
        blist = (sel.astype(jnp.int32)
                 * jnp.arange(n_b, dtype=jnp.int32)[None, :, None]).sum(axis=1)
        # Repeat the last present behavior into unused slots so the weight
        # index_maps return the same block index and the DMA is elided.
        slot = jnp.minimum(jnp.arange(n_b, dtype=jnp.int32)[None, :],
                           jnp.maximum(count[:, None] - 1, 0))
        blist = jnp.take_along_axis(blist, slot, axis=1).reshape(-1)      # (num_tiles*n_b,)
        run = (jnp.arange(n_b, dtype=jnp.int32)[None, :]
               < count[:, None]).astype(jnp.int32).reshape(-1)

        # Weight index_maps: for skipped slots freeze the f index at the last
        # slab of the previous (active) slot so no re-fetch happens either.
        def _frozen_f(i, k, f, rn):
            r = rn[i * n_b + k]
            return f * r + (num_f - 1) * (1 - r)

        def _w1_map(i, k, f, bl, rn):
            return (bl[i * n_b + k], 0, _frozen_f(i, k, f, rn))

        def _b1_map(i, k, f, bl, rn):
            return (bl[i * n_b + k], 0, _frozen_f(i, k, f, rn))

        def _w2_map(i, k, f, bl, rn):
            return (bl[i * n_b + k], _frozen_f(i, k, f, rn), 0)

        def _b2_map(i, k, f, bl, rn):
            return (bl[i * n_b + k], 0, 0)

        kern = functools.partial(_bpff_kernel, n_b=n_b)
        out_sorted = pl.pallas_call(
            kern,
            out_shape=jax.ShapeDtypeStruct((Np, H), out_dtype),
            grid_spec=pltpu.PrefetchScalarGridSpec(
                num_scalar_prefetch=2,
                grid=(num_tiles, n_b, num_f),
                in_specs=[
                    pl.BlockSpec((tile_n, H), lambda i, k, f, bl, rn: (i, 0)),   # x rows
                    pl.BlockSpec((tile_n, 1), lambda i, k, f, bl, rn: (i, 0)),   # b_seq
                    pl.BlockSpec((pl.Squeezed(), H, f_tile_eff), _w1_map),       # W1 slab
                    pl.BlockSpec((pl.Squeezed(), 1, f_tile_eff), _b1_map),       # b1 slab
                    pl.BlockSpec((pl.Squeezed(), f_tile_eff, H), _w2_map),       # W2 slab
                    pl.BlockSpec((pl.Squeezed(), 1, H), _b2_map),                # b2
                ],
                out_specs=pl.BlockSpec((tile_n, H), lambda i, k, f, bl, rn: (i, 0)),
                scratch_shapes=[pltpu.VMEM((tile_n, H), jnp.float32),   # d_ff accumulator
                                pltpu.VMEM((tile_n, H), jnp.float32)],  # selected-output acc
            ),
            compiler_params=pltpu.CompilerParams(
                dimension_semantics=("parallel", "arbitrary", "arbitrary"),
                vmem_limit_bytes=vmem_limit),
        )(blist, run, xs, bss.reshape(Np, 1), w1c, b1f, w2c, b2f)

        out = jnp.take(out_sorted, inv, axis=0)[:N]
    else:
        if Np != N:
            xf = jnp.pad(xf, ((0, Np - N), (0, 0)))
        out = pl.pallas_call(
            _pff_kernel,
            out_shape=jax.ShapeDtypeStruct((Np, H), out_dtype),
            grid_spec=pltpu.PrefetchScalarGridSpec(
                num_scalar_prefetch=0,
                grid=(num_tiles, num_f),
                in_specs=[
                    pl.BlockSpec((tile_n, H), lambda i, f: (i, 0)),
                    pl.BlockSpec((H, f_tile_eff), lambda i, f: (0, f)),
                    pl.BlockSpec((1, f_tile_eff), lambda i, f: (0, f)),
                    pl.BlockSpec((f_tile_eff, H), lambda i, f: (f, 0)),
                    pl.BlockSpec((1, H), lambda i, f: (0, 0)),
                ],
                out_specs=pl.BlockSpec((tile_n, H), lambda i, f: (i, 0)),
                scratch_shapes=[pltpu.VMEM((tile_n, H), jnp.float32)],
            ),
            compiler_params=pltpu.CompilerParams(
                dimension_semantics=("parallel", "arbitrary"),
                vmem_limit_bytes=vmem_limit),
        )(xf.astype(compute_dtype), w1c[0], b1f[0], w2c[0], b2f[0])
        out = out[:N]

    return out.reshape(B, T, H)


# ----------------------------------------------------------------------------
# Params / references
# ----------------------------------------------------------------------------
def init_params(key, d_model, d_ff, n_b):
    """nn.Linear weights ~ N(0, 0.02), biases zero (matches _init_weights)."""
    k1, k2 = jax.random.split(key)
    w1 = 0.02 * jax.random.normal(k1, (n_b, d_model, d_ff), jnp.float32)
    b1 = jnp.zeros((n_b, 1, d_ff), jnp.float32)
    w2 = 0.02 * jax.random.normal(k2, (n_b, d_ff, d_model), jnp.float32)
    b2 = jnp.zeros((n_b, 1, d_model), jnp.float32)
    return w1, b1, w2, b2


def ref_multi_behavior_pff(x, b_seq, params, n_b):
    """Pure-JAX reference replicating the PyTorch multi_behavior_pff."""
    w1, b1, w2, b2 = params
    outs = [jnp.zeros_like(x)]
    for i in range(n_b):
        h = jnp.maximum(jnp.einsum('bth,hf->btf', x, w1[i]) + b1[i, 0], 0.0)
        outs.append(jnp.einsum('btf,fh->bth', h, w2[i]) + b2[i, 0])
    stacked = jnp.stack(outs, axis=0)                        # (n_b+1, B, T, H)
    oh = jax.nn.one_hot(b_seq, n_b + 1, dtype=jnp.float32)   # (B, T, n_b+1)
    return jnp.einsum('nbth,btn->bth', stacked, oh)


def ref_single_pff(x, params):
    w1, b1, w2, b2 = params
    h = jnp.maximum(jnp.einsum('bth,hf->btf', x, w1[0]) + b1[0, 0], 0.0)
    return jnp.einsum('btf,fh->bth', h, w2[0]) + b2[0, 0]


if __name__ == "__main__":
    B, T, d_model, d_ff, n_b = 2, 63, 128, 256, 3

    key = jax.random.PRNGKey(0)
    kx, kb, kp = jax.random.split(key, 3)

    x = jax.random.normal(kx, (B, T, d_model), jnp.float32)
    # b_seq in [0, n_b]; 0 means padding
    b_seq = jax.random.randint(kb, (B, T), 0, n_b + 1, dtype=jnp.int32)
    params = init_params(kp, d_model, d_ff, n_b)

    ref = ref_multi_behavior_pff(x, b_seq, params, n_b)

    # Multi-behavior path, f32 compute: several row tiles, d_ff tiling, row padding.
    out = behavior_specific_pff(x, b_seq, params, bpff=True, n_b=n_b,
                                tile_n=32, f_tile=128, compute_dtype=jnp.float32)
    out = jax.block_until_ready(out)
    assert out.shape == (B, T, d_model)
    assert jnp.allclose(out, ref, atol=1e-5, rtol=1e-5)

    # Multi-behavior path, default config (bf16 compute, f32 accumulation).
    out_bf16 = behavior_specific_pff(x, b_seq, params, bpff=True, n_b=n_b)
    out_bf16 = jax.block_until_ready(out_bf16)
    assert jnp.allclose(out_bf16.astype(jnp.float32), ref, atol=2e-2, rtol=2e-1)

    # Single shared PFF path (bpff=False).
    out_single = behavior_specific_pff(x, None, params, bpff=False, n_b=1,
                                       compute_dtype=jnp.float32)
    out_single = jax.block_until_ready(out_single)
    assert jnp.allclose(out_single, ref_single_pff(x, params), atol=1e-5, rtol=1e-5)

    print("KERNEL_OK")
</pallas_src>

<mosaic_0001>
module attributes {stable_mosaic.version = 11 : i64} {
  func.func @_bpff_kernel(%arg0: i32, %arg1: i32, %arg2: i32, %arg3: memref<12xi32, #tpu.memory_space<smem>>, %arg4: memref<12xi32, #tpu.memory_space<smem>>, %arg5: memref<32x128xf32, #tpu.memory_space<vmem>>, %arg6: memref<32x1xi32, #tpu.memory_space<vmem>>, %arg7: memref<1x128x128xf32, #tpu.memory_space<vmem>>, %arg8: memref<1x1x128xf32, #tpu.memory_space<vmem>>, %arg9: memref<1x128x128xf32, #tpu.memory_space<vmem>>, %arg10: memref<1x1x128xf32, #tpu.memory_space<vmem>>, %arg11: memref<32x128xf32, #tpu.memory_space<vmem>>, %arg12: memref<32x128xf32, #tpu.memory_space<vmem>>, %arg13: memref<32x128xf32, #tpu.memory_space<vmem>>) attributes {dimension_semantics = [#tpu.dimension_semantics<parallel>, #tpu.dimension_semantics<arbitrary>, #tpu.dimension_semantics<arbitrary>], iteration_bounds = array<i64: 4, 3, 2>, scalar_prefetch = 2 : i64, scratch_operands = 2 : i64, tpu.core_type = #tpu.core_type<tc>, window_params = [{transform_indices = @transform_0, window_bounds = array<i64: 32, 128>}, {transform_indices = @transform_1, window_bounds = array<i64: 32, 1>}, {transform_indices = @transform_2, window_bounds = array<i64: 1, 128, 128>}, {transform_indices = @transform_3, window_bounds = array<i64: 1, 1, 128>}, {transform_indices = @transform_4, window_bounds = array<i64: 1, 128, 128>}, {transform_indices = @transform_5, window_bounds = array<i64: 1, 1, 128>}, {transform_indices = @transform_6, window_bounds = array<i64: 32, 128>}]} {
    %c0_i32 = arith.constant 0 : i32
    %0 = arith.cmpi eq, %arg1, %c0_i32 : i32
    %c0_i32_0 = arith.constant 0 : i32
    %1 = arith.cmpi eq, %arg2, %c0_i32_0 : i32
    %2 = arith.andi %0, %1 : i1
    %3 = arith.extui %2 : i1 to i32
    %c0_i32_1 = arith.constant 0 : i32
    %4 = arith.cmpi ne, %3, %c0_i32_1 : i32
    scf.if %4 {
      %cst = arith.constant 0.000000e+00 : f32
      %17 = vector.broadcast %cst : f32 to vector<32x128xf32>
      %c0 = arith.constant 0 : index
      %c0_5 = arith.constant 0 : index
      %18 = vector.load %arg13[%c0, %c0_5] : memref<32x128xf32, #tpu.memory_space<vmem>>, vector<32x128xf32>
      tpu.vector_store %arg13[%c0, %c0_5], %17 {strides = array<i32>} : memref<32x128xf32, #tpu.memory_space<vmem>>, vector<32x128xf32>,
    } else {
    }
    %c3_i32 = arith.constant 3 : i32
    %5 = arith.muli %arg0, %c3_i32 : i32
    %6 = arith.addi %5, %arg1 : i32
    %7 = arith.index_cast %6 : i32 to index
    %8 = memref.load %arg4[%7] : memref<12xi32, #tpu.memory_space<smem>>
    %c0_i32_2 = arith.constant 0 : i32
    %9 = arith.cmpi ne, %8, %c0_i32_2 : i32
    %10 = arith.extui %9 : i1 to i32
    %c0_i32_3 = arith.constant 0 : i32
    %11 = arith.cmpi ne, %10, %c0_i32_3 : i32
    scf.if %11 {
      %c0_i32_5 = arith.constant 0 : i32
      %17 = arith.cmpi eq, %arg2, %c0_i32_5 : i32
      %18 = arith.extui %17 : i1 to i32
      %c0_i32_6 = arith.constant 0 : i32
      %19 = arith.cmpi ne, %18, %c0_i32_6 : i32
      scf.if %19 {
        %cst_25 = arith.constant 0.000000e+00 : f32
        %39 = vector.broadcast %cst_25 : f32 to vector<32x128xf32>
        %c0_26 = arith.constant 0 : index
        %c0_27 = arith.constant 0 : index
        %40 = vector.load %arg12[%c0_26, %c0_27] : memref<32x128xf32, #tpu.memory_space<vmem>>, vector<32x128xf32>
        tpu.vector_store %arg12[%c0_26, %c0_27], %39 {strides = array<i32>} : memref<32x128xf32, #tpu.memory_space<vmem>>, vector<32x128xf32>,
      } else {
      }
      %c0 = arith.constant 0 : index
      %c0_7 = arith.constant 0 : index
      %20 = vector.load %arg5[%c0, %c0_7] : memref<32x128xf32, #tpu.memory_space<vmem>>, vector<32x128xf32>
      %c0_8 = arith.constant 0 : index
      %c0_9 = arith.constant 0 : index
      %c0_10 = arith.constant 0 : index
      %21 = vector.load %arg7[%c0_8, %c0_9, %c0_10] : memref<1x128x128xf32, #tpu.memory_space<vmem>>, vector<1x128x128xf32>
      %22 = vector.shape_cast %21 : vector<1x128x128xf32> to vector<128x128xf32>
      %cst = arith.constant dense<0.000000e+00> : vector<32x128xf32>
      %23 = tpu.matmul %20, %22, %cst {dimension_numbers = #tpu.dot_dimension_numbers<[1], [0], [0], [1], [0, 0, 1, 1], [], []>} : vector<32x128xf32>, vector<128x128xf32>, vector<32x128xf32> -> vector<32x128xf32>
      %c0_11 = arith.constant 0 : index
      %c0_12 = arith.constant 0 : index
      %c0_13 = arith.constant 0 : index
      %24 = vector.load %arg8[%c0_11, %c0_12, %c0_13] : memref<1x1x128xf32, #tpu.memory_space<vmem>>, vector<1x1x128xf32>
      %25 = vector.shape_cast %24 : vector<1x1x128xf32> to vector<1x128xf32>
      %26 = vector.broadcast %25 : vector<1x128xf32> to vector<32x128xf32>
      %27 = arith.addf %23, %26 : vector<32x128xf32>
      %cst_14 = arith.constant 0.000000e+00 : f32
      %28 = vector.broadcast %cst_14 : f32 to vector<32x128xf32>
      %29 = arith.maximumf %27, %28 : vector<32x128xf32>
      %c0_15 = arith.constant 0 : index
      %c0_16 = arith.constant 0 : index
      %30 = vector.load %arg12[%c0_15, %c0_16] : memref<32x128xf32, #tpu.memory_space<vmem>>, vector<32x128xf32>
      %c0_17 = arith.constant 0 : index
      %c0_18 = arith.constant 0 : index
      %c0_19 = arith.constant 0 : index
      %31 = vector.load %arg9[%c0_17, %c0_18, %c0_19] : memref<1x128x128xf32, #tpu.memory_space<vmem>>, vector<1x128x128xf32>
      %32 = vector.shape_cast %31 : vector<1x128x128xf32> to vector<128x128xf32>
      %cst_20 = arith.constant dense<0.000000e+00> : vector<32x128xf32>
      %33 = tpu.matmul %29, %32, %cst_20 {dimension_numbers = #tpu.dot_dimension_numbers<[1], [0], [0], [1], [0, 0, 1, 1], [], []>} : vector<32x128xf32>, vector<128x128xf32>, vector<32x128xf32> -> vector<32x128xf32>
      %34 = arith.addf %30, %33 : vector<32x128xf32>
      %c0_21 = arith.constant 0 : index
      %c0_22 = arith.constant 0 : index
      %35 = vector.load %arg12[%c0_21, %c0_22] : memref<32x128xf32, #tpu.memory_space<vmem>>, vector<32x128xf32>
      tpu.vector_store %arg12[%c0_21, %c0_22], %34 {strides = array<i32>} : memref<32x128xf32, #tpu.memory_space<vmem>>, vector<32x128xf32>,
      %c1_i32_23 = arith.constant 1 : i32
      %36 = arith.cmpi eq, %arg2, %c1_i32_23 : i32
      %37 = arith.extui %36 : i1 to i32
      %c0_i32_24 = arith.constant 0 : i32
      %38 = arith.cmpi ne, %37, %c0_i32_24 : i32
      scf.if %38 {
        %c3_i32_25 = arith.constant 3 : i32
        %39 = arith.muli %arg0, %c3_i32_25 : i32
        %40 = arith.addi %39, %arg1 : i32
        %41 = arith.index_cast %40 : i32 to index
        %42 = memref.load %arg3[%41] : memref<12xi32, #tpu.memory_space<smem>>
        %c0_26 = arith.constant 0 : index
        %c0_27 = arith.constant 0 : index
        %43 = vector.load %arg6[%c0_26, %c0_27] : memref<32x1xi32, #tpu.memory_space<vmem>>, vector<32x1xi32>
        %c1_i32_28 = arith.constant 1 : i32
        %44 = arith.addi %42, %c1_i32_28 : i32
        %45 = vector.broadcast %44 : i32 to vector<32x1xi32>
        %46 = arith.cmpi eq, %43, %45 : vector<32x1xi32>
        %c0_29 = arith.constant 0 : index
        %c0_30 = arith.constant 0 : index
        %47 = vector.load %arg13[%c0_29, %c0_30] : memref<32x128xf32, #tpu.memory_space<vmem>>, vector<32x128xf32>
        %c0_31 = arith.constant 0 : index
        %c0_32 = arith.constant 0 : index
        %48 = vector.load %arg12[%c0_31, %c0_32] : memref<32x128xf32, #tpu.memory_space<vmem>>, vector<32x128xf32>
        %c0_33 = arith.constant 0 : index
        %c0_34 = arith.constant 0 : index
        %c0_35 = arith.constant 0 : index
        %49 = vector.load %arg10[%c0_33, %c0_34, %c0_35] : memref<1x1x128xf32, #tpu.memory_space<vmem>>, vector<1x1x128xf32>
        %50 = vector.shape_cast %49 : vector<1x1x128xf32> to vector<1x128xf32>
        %51 = vector.broadcast %50 : vector<1x128xf32> to vector<32x128xf32>
        %52 = arith.addf %48, %51 : vector<32x128xf32>
        %cst_36 = arith.constant 0.000000e+00 : f32
        %53 = vector.shape_cast %46 : vector<32x1xi1> to vector<32x1xi1>
        %54 = vector.broadcast %53 : vector<32x1xi1> to vector<32x128xi1>
        %55 = vector.broadcast %cst_36 : f32 to vector<32x128xf32>
        %56 = arith.select %54, %52, %55 : vector<32x128xi1>, vector<32x128xf32>
        %57 = arith.addf %47, %56 : vector<32x128xf32>
        %c0_37 = arith.constant 0 : index
        %c0_38 = arith.constant 0 : index
        %58 = vector.load %arg13[%c0_37, %c0_38] : memref<32x128xf32, #tpu.memory_space<vmem>>, vector<32x128xf32>
        tpu.vector_store %arg13[%c0_37, %c0_38], %57 {strides = array<i32>} : memref<32x128xf32, #tpu.memory_space<vmem>>, vector<32x128xf32>,
      } else {
      }
    } else {
    }
    %c2_i32 = arith.constant 2 : i32
    %12 = arith.cmpi eq, %arg1, %c2_i32 : i32
    %c1_i32 = arith.constant 1 : i32
    %13 = arith.cmpi eq, %arg2, %c1_i32 : i32
    %14 = arith.andi %12, %13 : i1
    %15 = arith.extui %14 : i1 to i32
    %c0_i32_4 = arith.constant 0 : i32
    %16 = arith.cmpi ne, %15, %c0_i32_4 : i32
    scf.if %16 {
      %c0 = arith.constant 0 : index
      %c0_5 = arith.constant 0 : index
      %17 = vector.load %arg13[%c0, %c0_5] : memref<32x128xf32, #tpu.memory_space<vmem>>, vector<32x128xf32>
      %c0_6 = arith.constant 0 : index
      %c0_7 = arith.constant 0 : index
      %18 = vector.load %arg11[%c0_6, %c0_7] : memref<32x128xf32, #tpu.memory_space<vmem>>, vector<32x128xf32>
      tpu.vector_store %arg11[%c0_6, %c0_7], %17 {strides = array<i32>} : memref<32x128xf32, #tpu.memory_space<vmem>>, vector<32x128xf32>,
    } else {
    }
    return
  }
  func.func @transform_0(%arg0: i32, %arg1: i32, %arg2: i32, %arg3: memref<12xi32, #tpu.memory_space<smem>>, %arg4: memref<12xi32, #tpu.memory_space<smem>>) -> (i32, i32) {
    %c0_i32 = arith.constant 0 : i32
    %c0_i32_0 = arith.constant 0 : i32
    return %arg0, %c0_i32 : i32, i32
  }
  func.func @transform_1(%arg0: i32, %arg1: i32, %arg2: i32, %arg3: memref<12xi32, #tpu.memory_space<smem>>, %arg4: memref<12xi32, #tpu.memory_space<smem>>) -> (i32, i32) {
    %c0_i32 = arith.constant 0 : i32
    %c0_i32_0 = arith.constant 0 : i32
    return %arg0, %c0_i32 : i32, i32
  }
  func.func @transform_2(%arg0: i32, %arg1: i32, %arg2: i32, %arg3: memref<12xi32, #tpu.memory_space<smem>>, %arg4: memref<12xi32, #tpu.memory_space<smem>>) -> (i32, i32, i32) {
    %c3_i32 = arith.constant 3 : i32
    %0 = arith.muli %arg0, %c3_i32 : i32
    %1 = arith.addi %0, %arg1 : i32
    %2 = arith.index_cast %1 : i32 to index
    %3 = memref.load %arg3[%2] : memref<12xi32, #tpu.memory_space<smem>>
    %c3_i32_0 = arith.constant 3 : i32
    %4 = arith.muli %arg0, %c3_i32_0 : i32
    %5 = arith.addi %4, %arg1 : i32
    %6 = arith.index_cast %5 : i32 to index
    %7 = memref.load %arg4[%6] : memref<12xi32, #tpu.memory_space<smem>>
    %8 = arith.muli %arg2, %7 : i32
    %c1_i32 = arith.constant 1 : i32
    %9 = arith.subi %c1_i32, %7 : i32
    %c1_i32_1 = arith.constant 1 : i32
    %10 = arith.muli %c1_i32_1, %9 : i32
    %11 = arith.addi %8, %10 : i32
    %c0_i32 = arith.constant 0 : i32
    %c0_i32_2 = arith.constant 0 : i32
    return %3, %c0_i32, %11 : i32, i32, i32
  }
  func.func @transform_3(%arg0: i32, %arg1: i32, %arg2: i32, %arg3: memref<12xi32, #tpu.memory_space<smem>>, %arg4: memref<12xi32, #tpu.memory_space<smem>>) -> (i32, i32, i32) {
    %c3_i32 = arith.constant 3 : i32
    %0 = arith.muli %arg0, %c3_i32 : i32
    %1 = arith.addi %0, %arg1 : i32
    %2 = arith.index_cast %1 : i32 to index
    %3 = memref.load %arg3[%2] : memref<12xi32, #tpu.memory_space<smem>>
    %c3_i32_0 = arith.constant 3 : i32
    %4 = arith.muli %arg0, %c3_i32_0 : i32
    %5 = arith.addi %4, %arg1 : i32
    %6 = arith.index_cast %5 : i32 to index
    %7 = memref.load %arg4[%6] : memref<12xi32, #tpu.memory_space<smem>>
    %8 = arith.muli %arg2, %7 : i32
    %c1_i32 = arith.constant 1 : i32
    %9 = arith.subi %c1_i32, %7 : i32
    %c1_i32_1 = arith.constant 1 : i32
    %10 = arith.muli %c1_i32_1, %9 : i32
    %11 = arith.addi %8, %10 : i32
    %c0_i32 = arith.constant 0 : i32
    %c0_i32_2 = arith.constant 0 : i32
    return %3, %c0_i32, %11 : i32, i32, i32
  }
  func.func @transform_4(%arg0: i32, %arg1: i32, %arg2: i32, %arg3: memref<12xi32, #tpu.memory_space<smem>>, %arg4: memref<12xi32, #tpu.memory_space<smem>>) -> (i32, i32, i32) {
    %c3_i32 = arith.constant 3 : i32
    %0 = arith.muli %arg0, %c3_i32 : i32
    %1 = arith.addi %0, %arg1 : i32
    %2 = arith.index_cast %1 : i32 to index
    %3 = memref.load %arg3[%2] : memref<12xi32, #tpu.memory_space<smem>>
    %c3_i32_0 = arith.constant 3 : i32
    %4 = arith.muli %arg0, %c3_i32_0 : i32
    %5 = arith.addi %4, %arg1 : i32
    %6 = arith.index_cast %5 : i32 to index
    %7 = memref.load %arg4[%6] : memref<12xi32, #tpu.memory_space<smem>>
    %8 = arith.muli %arg2, %7 : i32
    %c1_i32 = arith.constant 1 : i32
    %9 = arith.subi %c1_i32, %7 : i32
    %c1_i32_1 = arith.constant 1 : i32
    %10 = arith.muli %c1_i32_1, %9 : i32
    %11 = arith.addi %8, %10 : i32
    %c0_i32 = arith.constant 0 : i32
    %c0_i32_2 = arith.constant 0 : i32
    return %3, %11, %c0_i32 : i32, i32, i32
  }
  func.func @transform_5(%arg0: i32, %arg1: i32, %arg2: i32, %arg3: memref<12xi32, #tpu.memory_space<smem>>, %arg4: memref<12xi32, #tpu.memory_space<smem>>) -> (i32, i32, i32) {
    %c3_i32 = arith.constant 3 : i32
    %0 = arith.muli %arg0, %c3_i32 : i32
    %1 = arith.addi %0, %arg1 : i32
    %2 = arith.index_cast %1 : i32 to index
    %3 = memref.load %arg3[%2] : memref<12xi32, #tpu.memory_space<smem>>
    %c0_i32 = arith.constant 0 : i32
    %c0_i32_0 = arith.constant 0 : i32
    %c0_i32_1 = arith.constant 0 : i32
    return %3, %c0_i32, %c0_i32_0 : i32, i32, i32
  }
  func.func @transform_6(%arg0: i32, %arg1: i32, %arg2: i32, %arg3: memref<12xi32, #tpu.memory_space<smem>>, %arg4: memref<12xi32, #tpu.memory_space<smem>>) -> (i32, i32) {
    %c0_i32 = arith.constant 0 : i32
    %c0_i32_0 = arith.constant 0 : i32
    return %arg0, %c0_i32 : i32, i32
  }
}

</mosaic_0001>

<bundles_post_ra>
// kernel: tpu_custom_call.1
= control target key start
LH: loop header
LB: loop body
LE: loop exit
PB: predicated region body
PF: predicated region fallthrough
CT: control target
= control target key end

     0   :  { %s1635_s27 = smov [#allocation5]   ;;  %s1636_s30 = smov [#allocation6]   ;;  %s2227_s0 = inlined_call_operand.hbm [shape: s32[12], index: 0, kind: input, shape index: {}]   ;;  %s2228_s2 = inlined_call_operand.vmem [shape: f32[128,128], index: 2, kind: input, shape index: {}]   ;;  %s2229_s3 = inlined_call_operand.vmem [shape: s32[128,1], index: 3, kind: input, shape index: {}]   ;;  %s2230_s4 = inlined_call_operand.hbm [shape: f32[3,128,256], index: 4, kind: input, shape index: {}]   ;;  %s2231_s5 = inlined_call_operand.vmem [shape: f32[3,1,256], index: 5, kind: input, shape index: {}]   ;;  %s2232_s6 = inlined_call_operand.hbm [shape: f32[3,256,128], index: 6, kind: input, shape index: {}]   ;;  %s2233_s7 = inlined_call_operand.vmem [shape: f32[3,1,128], index: 7, kind: input, shape index: {}]   ;;  %s2234_s8 = inlined_call_operand.hbm [shape: f32[128,128], index: 8, kind: output, shape index: {}]   ;;  %s2235_s1 = inlined_call_operand.hbm [shape: s32[12], index: 1, kind: input, shape index: {}]  }
   0x1   :  { %2268 = sst [smem:[#allocation42_spill]] %s2228_s2 }
   0x2   :  { %2269 = sst [smem:[#allocation43_spill]] %s2229_s3 }
   0x3   :  { %2270 = sst [smem:[#allocation44_spill]] %s2230_s4 }
   0x4   :  { %2271 = sst [smem:[#allocation45_spill]] %s2231_s5 }
   0x5   :  { %2272 = sst [smem:[#allocation46_spill]] %s2232_s6 }
   0x6   :  { %2273 = sst [smem:[#allocation47_spill]] %s2233_s7 }
   0x7   :  { %2274 = sst [smem:[#allocation48_spill]] %s2234_s8 }
   0x8   :  { %14 = dma.hbm_to_smem %s2227_s0, 16, %s1635_s27, [#allocation4] }
   0x9   :  { %16 = dma.hbm_to_smem %s2235_s1, 16, %s1636_s30, [#allocation4] }
   0xa   :  { %1557 = dma.done.wait [#allocation4], 32 }
   0xb   :  { %1558 = vsyncadd [#allocation4], 4294967264 }
   0xc   :  { %18 = sfence }
   0xd   :  { %19 = vsyncpa [#allocation8], 0 }
   0xe   :  { %21 = vsyncpa [#allocation8 + $0x1], 0 }
   0xf   :  { %22 = vsyncpa [#allocation11], 0 }
  0x10   :  { %24 = vsyncpa [#allocation11 + $0x1], 0 }
  0x11   :  { %25 = vsyncpa [#allocation9], 0 }
  0x12   :  { %27 = vsyncpa [#allocation9 + $0x1], 0  ;;  %s1699_s11 = smov 0   ;;  %s1701_s12 = smov 0  }
  0x13   :  { %s1703_s13 = smov 0   ;;  %s1705_s0 = smov 0  }
  0x14   :  { %s1707_s14 = smov 0   ;;  %s1709_s1 = smov 0  }
  0x15   :  { %s1711_s15 = smov 0   ;;  %s1713_s16 = smov 0  }
  0x16   :  { %s1715_s17 = smov 0   ;;  %s1717_s18 = smov 0  }
  0x17   :  { %s1719_s19 = smov 0   ;;  %s1721_s20 = smov 0  }
  0x18   :  { %s1723_s21 = smov 0   ;;  %s1725_s22 = smov 0  }
  0x19   :  { %s1727_s23 = smov 0   ;;  %s1729_s24 = smov 0  }
  0x1a LB: > { %2275 = sst [smem:[#allocation25_spill]] %s1581_s13  ;;  %s2238_s25 = sadd.s32 4294967295, %s1633_s24   ;;  %s1633_s24 = sphi %s1729_s24, %s33_s24   ;;  %s1629_s23 = sphi %s1727_s23, %s2356_s23   ;;  %s1625_s22 = sphi %s1725_s22, %s2355_s22   ;;  %s1621_s21 = sphi %s1723_s21, %s2363_s21   ;;  %s1617_s20 = sphi %s1721_s20, %s2362_s20   ;;  %s1613_s19 = sphi %s1719_s19, %s2352_s19   ;;  %s1609_s18 = sphi %s1717_s18, %s2361_s18   ;;  %s1605_s17 = sphi %s1715_s17, %s2351_s17   ;;  %s1601_s16 = sphi %s1713_s16, %s2350_s16   ;;  %s1597_s15 = sphi %s1711_s15, %s2349_s15   ;;  %s1593_s1 = sphi %s1709_s1, %s2348_s1   ;;  %s1589_s14 = sphi %s1707_s14, %s2360_s14   ;;  %s1585_s0 = sphi %s1705_s0, %s2359_s0   ;;  %s1581_s13 = sphi %s1703_s13, %s2346_s13   ;;  %s1577_s12 = sphi %s1701_s12, %s2358_s12   ;;  %s1573_s11 = sphi %s1699_s11, %s2357_s11  }
  0x1b   : > { %2276 = sst [smem:[#allocation26_spill]] %s1593_s1  ;;  %s45_s26 = sadd.s32 1, %s1621_s21 }
  0x1c   : > { %2277 = sst [smem:[#allocation27_spill]] %s1601_s16  ;;  %p46_p0 = scmp.ge.s32.totalorder %s45_s26, 2 }
  0x1d   : > { %2278 = sst [smem:[#allocation28_spill]] %s1605_s17  ;;  %s48_s27 = sadd.s32 1, %s1625_s22 }
  0x1e   : > { %2279 = sst [smem:[#allocation29_spill]] %s1609_s18  ;;  %s108_s29 = smul.u32 3, %s1629_s23 }
  0x1f   : > { %2280 = sst [smem:[#allocation30_spill]] %s1613_s19  ;;  %s2365_s26 = smov (%p46_p0, %s45_s26), 0 }
  0x20   : > { %2281 = sst [smem:[#allocation31_spill]] %s1617_s20  ;;  %s2367_s27 = smov (!%p46_p0, %s48_s27), %s1625_s22 }
  0x21   : > { %2282 = sst [smem:[#allocation32_spill]] %s1625_s22  ;;  %s52_s30 = sadd.s32 1, %s1629_s23 }
  0x22   : > { %2283 = sst [smem:[#allocation33_spill]] %s1629_s23  ;;  %s1789_s9 = sadd.s32 %s1625_s22, %s108_s29 }
  0x23   : > { %2284 = sst [smem:[#allocation34_spill]] %s2365_s26  ;;  %p50_p1 = scmp.ge.s32.totalorder %s2367_s27, 3 }
  0x24   : > { %2285 = sst [smem:[#allocation35_spill]] %s1789_s9  ;;  %p134_p2 = scmp.ne.s32.totalorder %s1605_s17, %s1601_s16 }
  0x25   : > { %s111_s10 = sld [smem:[#allocation6 + %s1789_s9]]  ;;  %p135_p3 = scmp.eq.s32.totalorder %s1633_s24, 0 }
  0x26   : > { %s2369_s27 = smov (%p50_p1, %s2367_s27), 0  ;;  %s2371_s30 = smov (!%p50_p1, %s52_s30), %s1629_s23 }
  0x27   : > { %2286 = sst [smem:[#allocation36_spill]] %s2369_s27  ;;  %p140_p4 = scmp.ne.s32.totalorder %s1601_s16, %s1597_s15 }
  0x28   : > { %p54_p5 = scmp.ge.s32.totalorder %s2371_s30, 4  ;;  %p1803_p6 = scmp.eq.s32.totalorder %s2238_s25, 0 }
  0x29   : > { %s1808_s22 = sld [smem:[#allocation5 + %s1789_s9]]  ;;  %p1812_p7 = por %p135_p3, %p134_p2 }
  0x2a   : > { %s2373_s30 = smov (%p54_p5, %s2371_s30), 0  ;;  %s1820_s28 = sld [smem:[#allocation5 + %s1789_s9]] }
  0x2b   : > { %2289 = sst [smem:[#allocation37_spill]] %s2373_s30  ;;  %s112_s15 = smul.u32 %s1621_s21, %s111_s10 }
  0x2c   : > { %s115_s25 = smul.u32 3, %s2373_s30  ;;  %p1825_p8 = por %p1803_p6, %p140_p4 }
  0x2d   : > { %s113_s3 = ssub.s32 1, %s111_s10  ;;  %s195_s7 = sld [smem:[#allocation6 + %s1789_s9]] }
  0x2e   : > { %s2290_s5 = scalar_select %p1825_p8, 1, 0 }
  0x2f   : > { %s116_s2 = sadd.s32 %s115_s25, %s2369_s27  ;;  %p224_p9 = scmp.ne.s32.totalorder %s1589_s14, %s1585_s0 }
  0x30   : > { %2291 = sst [smem:[#allocation38_spill]] %s2290_s5  ;;  %s114_s20 = sadd.s32 %s113_s3, %s112_s15 }
  0x31   : > { %s117_s19 = sld [smem:[#allocation5 + %s116_s2]]  ;;  %p1836_p10 = por %p224_p9, %p1803_p6 }
  0x32   : > { %s118_s16 = sld [smem:[#allocation6 + %s116_s2]]  ;;  %s266_s5 = ssub.s32 %s1629_s23, %s2373_s30 }
  0x33   : > { %s201_s6 = sld [smem:[#allocation5 + %s116_s2]]  ;;  %s196_s9 = smul.u32 %s1621_s21, %s195_s7 }
  0x34   : > { %s2292_s4 = scalar_select %p1836_p10, 1, 0 }
  0x35   : > { %s202_s10 = sld [smem:[#allocation6 + %s116_s2]]  ;;  %s197_s25 = ssub.s32 1, %s195_s7 }
  0x36   : > { %p1843_p11 = scmp.eq.s32.totalorder %s266_s5, 0  ;;  %s269_s0 = sadd.s32 1, %s1581_s13 }
  0x37   : > { %s122_s27 = ssub.s32 %s1808_s22, %s117_s19  ;;  %s198_s3 = sadd.s32 %s197_s25, %s196_s9 }
  0x38   : > { %s119_s15 = smul.u32 %s118_s16, %s2365_s26  ;;  %s120_s29 = ssub.s32 1, %s118_s16 }
  0x39   : > { %s206_s2 = ssub.s32 %s1820_s28, %s201_s6  ;;  %p279_p12 = scmp.ne.s32.totalorder %s1581_s13, %s1577_s12 }
  0x3a   : > { %s121_s5 = sadd.s32 %s120_s29, %s119_s15  ;;  %s2294_s28 = sadd.s32 4294967295, %s1633_s24  }
  0x3b   : > { %s203_s7 = smul.u32 %s202_s10, %s2365_s26  ;;  %s123_s19 = ssub.s32 %s114_s20, %s121_s5 }
  0x3c   : > { %s204_s22 = ssub.s32 1, %s202_s10  ;;  %s124_s9 = sor.u32 %s123_s19, %s122_s27 }
  0x3d   : > { %s205_s25 = sadd.s32 %s204_s22, %s203_s7  ;;  %p125_p13 = scmp.eq.s32.totalorder %s124_s9, 0 }
  0x3e   : > { %s207_s6 = ssub.s32 %s198_s3, %s205_s25  ;;  %s2295_s30 = sld [smem:[#allocation35_spill]] }
  0x3f   : > { %s208_s16 = sor.u32 %s207_s6, %s206_s2  ;;  %p280_p0 = scmp.eq.s32.totalorder %s2294_s28, 23 }
  0x40   : > { %s2296_s15 = sadd.s32 1, %s1605_s17  ;;  %p209_p1 = scmp.eq.s32.totalorder %s208_s16, 0 }
  0x41   : > { %s1859_s29 = scalar_select %p125_p13, %s1605_s17, %s2296_s15  }
  0x42   : > { %p1864_p2 = por %p280_p0, %p279_p12  ;;  %s2300_s10 = sadd.s32 1, %s1593_s1 }
  0x43   : > { %2297 = sst [smem:[#allocation39_spill]] %s1859_s29  ;;  %p285_p4 = scmp.ne.s32.totalorder %s1577_s12, %s1573_s11 }
  0x44   : > { %s2298_s20 = scalar_select %p1864_p2, 1, 0 }
  0x45   : > { %s1871_s27 = scalar_select %p1843_p11, %s1581_s13, %s269_s0  }
  0x46   : > { %s1876_s3 = scalar_select %p209_p1, %s1593_s1, %s2300_s10  }
  0x47   : > { %2299 = sst [smem:[#allocation40_spill]] %s1871_s27  ;;  %s2302_s2 = sadd.s32 4294967294, %s1633_s24  }
  0x48   : > { %2301 = sst [smem:[#allocation41_spill]] %s1876_s3  ;;  %p286_p5 = scmp.eq.s32.totalorder %s2302_s2, 23 }
  0x49   : > { %p2254_p6 = scmp.lt.s32.totalorder %s1633_s24, 24  ;;  %s324_s7 = sand.u32 1, %s1605_s17  }
  0x4a   : > { %p1883_p9 = por %p286_p5, %p285_p4  ;;  %p218_p12 = scmp.ne.s32.totalorder %s1593_s1, %s1589_s14 }
  0x4b   : > { %s1077_s19 = sshll.u32 %s324_s7, 7  ;;  %p1894_p11 = pnand %p2254_p6, %p1812_p7 }
  0x4c   : > { %s2303_s5 = scalar_select %p1883_p9, 1, 0 }
  0x4d   : > { %s1220_s0 = scalar_select %p1812_p7, [#allocation5], [#allocation13] }
  0x4e   : > { %s1221_s22 = scalar_select %p1812_p7, %s2295_s30, 0 }
  0x4f   : > { %s2375_s0 = smov (!%p2254_p6, %s1220_s0), [#allocation17]  ;;  %p1913_p13 = por %p218_p12, %p135_p3 }
  0x50   : > { %s2377_s22 = smov (!%p2254_p6, %s1221_s22), 0  ;;  %s328_s28 = scalar_lea.vmem [#allocation7], %s1077_s19 }
  0x51   : > { %s1222_s9 = scalar_select %p1812_p7, [#allocation6], [#allocation14] }
  0x52   : > { %s331_s25 = sld [smem:[%s2375_s0 + %s2377_s22]]  ;;  %s343_s15 = sshll.u32 %s328_s28, 4  ;;  %s1925_s15 = int_to_ptr.vmem [resolvable:$true] %s343_s15 }
  0x53   : > { %s2379_s9 = smov (!%p2254_p6, %s1222_s9), [#allocation18]  ;;  %p1921_p0 = pnand %p2254_p6, %p1913_p13 }
  0x54   : > { %s2305_s6 = scalar_select %p1913_p13, 1, 0 }
  0x55   : > { %s332_s16 = sld [smem:[%s2379_s9 + %s2377_s22]]  ;;  %s1937_s3 = scalar_lea.sflag [#allocation8], %s324_s7 }
  0x56   : > { %s2306_s8 = scalar_select %p1921_p0, 1, 0 }
  0x57   : > { %s1225_s26 = scalar_select %p1913_p13, [#allocation5], [#allocation15] }
  0x58   : > { %s1078_s10 = sshll.u32 %s331_s25, 5  ;;  %s2307_s9 = sld [smem:[#allocation44_spill]] }
  0x59   : > { %p1413_p4 = pneg %p1894_p11 }
  0x5b   : > { %s333_s2 = smul.u32 %s1621_s21, %s332_s16  ;;  %s334_s0 = ssub.s32 1, %s332_s16 }
  0x5d   : > { %s335_s23 = sadd.s32 %s334_s0, %s333_s2 }
  0x5e   : > { %s340_s29 = sadd.s32 %s1078_s10, %s335_s23  ;;  %s1416_s16 = scalar_lea.hbm %s2307_s9, 12288 }
  0x5f   : > { %s1079_s17 = sshll.u32 %s340_s29, 7 }
  0x60   : > { %s1934_s28 = scalar_lea.hbm %s2307_s9, %s1079_s17 }
  0x61   : > { %s1411_s25 = scalar_lea.hbm %s1934_s28, 2048  ;;  %p1417_p3 = scmp.lt.s32.totalorder %s1934_s28, %s2307_s9 }
  0x62   : > { %p1412_p1 = scmp.ne.s32.totalorder %s1934_s28, %s1411_s25  ;;  %p1418_p6 = scmp.lt.s32.totalorder %s1416_s16, %s1411_s25 }
  0x64   : > { %p1414_p5 = pnand %p1413_p4, %p1412_p1  ;;  %p1419_p9 = por %p1418_p6, %p1417_p3 }
  0x66   : > { %p1415_p12 = pneg %p1414_p5 }
  0x68   : > { %p1420_p2 = pnand %p1419_p9, %p1415_p12 }
  0x6a   : > { %1423 = shalt.err (!%p1420_p2)
}
  0x6b   : > { %s1424_s17 = scalar_lea.vmem %s1925_s15, 2048  ;;  %s1637_s7 = smov [#allocation7]  }
  0x6c   : > { %p1425_p7 = scmp.ne.s32.totalorder %s1925_s15, %s1424_s17  ;;  %s1429_s0 = sshll.u32 %s1637_s7, 4  ;;  %s1430_s0 = int_to_ptr.vmem [resolvable:$false] %s1429_s0 }
  0x6d   : > { %s1431_s19 = scalar_lea.vmem %s1430_s0, 4096  ;;  %p1432_p5 = scmp.lt.s32.totalorder %s1925_s15, %s1430_s0 }
  0x6e   : > { %p1427_p10 = pnand %p1425_p7, %p1413_p4  ;;  %p1433_p8 = scmp.lt.s32.totalorder %s1431_s19, %s1424_s17 }
  0x70   : > { %p1428_p1 = pneg %p1427_p10  ;;  %p1434_p0 = por %p1433_p8, %p1432_p5 }
  0x72   : > { %p1435_p13 = pnand %p1434_p0, %p1428_p1 }
  0x74   : > { %1438 = shalt.err (!%p1435_p13)
}
  0x75   : > { %s1638_s22 = smov 256   ;;  %s2261_s25 = smov 128  }
  0x76   : > { %s2262_s23 = smov 8   ;;  %p2308_p8 = scmp.ne.s32.totalorder %s2305_s6, 0 }
  0x77   : > { %1241 = dma.hbm_to_vmem [thread:$0]  (!%p1894_p11), %s1934_s28, 2048, %s1925_s15, %s1937_s3, %s1638_s22, %s2261_s25, %s2262_s23  }
  0x78   : > { %s2381_s30 = smov (!%p2308_p8, %s2295_s30), 0  ;;  %p2309_p10 = scmp.lt.s32.totalorder %s1633_s24, 24 }
  0x79   : > { %s1227_s29 = scalar_select %p2308_p8, [#allocation6], [#allocation16] }
  0x7a   : > { %s2383_s26 = smov (!%p2309_p10, %s1225_s26), [#allocation19]  ;;  %p2310_p2 = pmov %p2309_p10 }
  0x7b   : > { %s377_s16 = sand.u32 1, %s1593_s1   ;;  %p2311_p6 = scmp.lt.s32.totalorder %s1633_s24, 25 }
  0x7c   : > { %s2385_s30 = smov (!%p2310_p2, %s2381_s30), 0  ;;  %p2312_p9 = scmp.ge.s32.totalorder %s1633_s24, 1 }
  0x7d   : > { %p2314_p0 = pmov %p2310_p2  ;;  %s384_s3 = sld [smem:[%s2383_s26 + %s2385_s30]] }
  0x7e   : > { %p1977_p13 = pnand %p2312_p9, %p2311_p6  ;;  %s1080_s15 = sshll.u32 %s377_s16, 7 }
  0x7f   : > { %s2387_s29 = smov (!%p2314_p0, %s1227_s29), [#allocation20]  ;;  %s381_s7 = scalar_lea.vmem [#allocation10], %s1080_s15 }
  0x80   : > { %s2313_s10 = scalar_select %p1977_p13, 1, 0 }
  0x81   : > { %s385_s18 = sld [smem:[%s2387_s29 + %s2385_s30]]  ;;  %s397_s0 = sshll.u32 %s381_s7, 4  ;;  %s1984_s0 = int_to_ptr.vmem [resolvable:$true] %s397_s0 }
  0x82   : > { %s2315_s1 = sld [smem:[#allocation46_spill]]  ;;  %s1991_s26 = scalar_lea.sflag [#allocation11], %s377_s16 }
  0x83   : > { %s1082_s17 = sshll.u32 %s384_s3, 5  ;;  %p2317_p3 = scmp.ne.s32.totalorder %s2306_s8, 0 }
  0x85   : > { %p1441_p7 = pneg %p2317_p3 }
  0x87   : > { %s386_s28 = smul.u32 %s1621_s21, %s385_s18  ;;  %s387_s2 = ssub.s32 1, %s385_s18 }
  0x88   : > { %s2316_s27 = smov %s2315_s1 }
  0x89   : > { %s388_s6 = sadd.s32 %s387_s2, %s386_s28  ;;  %s1444_s18 = scalar_lea.hbm %s2316_s27, 12288 }
  0x8a   : > { %s1081_s19 = sshll.u32 %s388_s6, 4 }
  0x8b   : > { %s394_s22 = sadd.s32 %s1082_s17, %s1081_s19 }
  0x8c   : > { %s1083_s25 = sshll.u32 %s394_s22, 7 }
  0x8d   : > { %s1989_s13 = scalar_lea.hbm %s2315_s1, %s1083_s25 }
  0x8e   : > { %s1439_s30 = scalar_lea.hbm %s1989_s13, 2048  ;;  %p1445_p1 = scmp.lt.s32.totalorder %s1989_s13, %s2316_s27 }
  0x8f   : > { %p1440_p11 = scmp.ne.s32.totalorder %s1989_s13, %s1439_s30  ;;  %p1446_p5 = scmp.lt.s32.totalorder %s1444_s18, %s1439_s30 }
  0x91   : > { %p1442_p4 = pnand %p1441_p7, %p1440_p11  ;;  %p1447_p8 = por %p1446_p5, %p1445_p1 }
  0x93   : > { %p1443_p12 = pneg %p1442_p4 }
  0x95   : > { %p1448_p10 = pnand %p1447_p8, %p1443_p12 }
  0x97   : > { %1451 = shalt.err (!%p1448_p10)
}
  0x98   : > { %s1452_s1 = scalar_lea.vmem %s1984_s0, 2048  ;;  %s1641_s9 = smov [#allocation10]  }
  0x99   : > { %p1453_p2 = scmp.ne.s32.totalorder %s1984_s0, %s1452_s1  ;;  %s1457_s25 = sshll.u32 %s1641_s9, 4  ;;  %s1458_s25 = int_to_ptr.vmem [resolvable:$false] %s1457_s25 }
  0x9a   : > { %s1459_s23 = scalar_lea.vmem %s1458_s25, 4096  ;;  %p1460_p0 = scmp.lt.s32.totalorder %s1984_s0, %s1458_s25 }
  0x9b   : > { %p1455_p6 = pnand %p1453_p2, %p1441_p7  ;;  %p1461_p11 = scmp.lt.s32.totalorder %s1459_s23, %s1452_s1 }
  0x9d   : > { %p1456_p9 = pneg %p1455_p6  ;;  %p1462_p4 = por %p1461_p11, %p1460_p0 }
  0x9f   : > { %p1463_p13 = pnand %p1462_p4, %p1456_p9 }
  0xa1   : > { %1466 = shalt.err (!%p1463_p13)
}
  0xa2   : > { %s2318_s16 = smov 8   ;;  %s2319_s2 = smov 128  }
  0xa3   : > { %1248 = dma.hbm_to_vmem [thread:$0]  (!%p2317_p3), %s1989_s13, 2048, %s1984_s0, %s1991_s26, %s2319_s2, %s2319_s2, %s2318_s16  }
  0xa4   : > { %p2320_p7 = scmp.ne.s32.totalorder %s2313_s10, 0 }
  0xa5   : > { %s2321_s17 = sld [smem:[#allocation27_spill]] (!%p2320_p7) }
  0xa6   : > { %421 = sbr.rel (%p2320_p7) target bundleno = 850 (0x352), region = 44  ;;  %s2322_s7 = sld [smem:[#allocation38_spill]] (!%p2320_p7) }
  0xab   : > { %s423_s6 = sand.u32 1, %s2321_s17  }
  0xac   : > { %s1085_s19 = sshll.u32 %s423_s6, 7  ;;  %s424_s22 = scalar_lea.sflag [#allocation8], %s423_s6 }
  0xad   : > { %s2018_s30 = scalar_lea.vmem [#allocation7], %s1085_s19  ;;  %p2323_p13 = scmp.ne.s32.totalorder %s2322_s7, 0 }
  0xaf   : > { %1560 = dma.done.wait (%p2323_p13), %s424_s22, 2048  }
  0xb0   : > { %1562 = vsyncadd (%p2323_p13), %s424_s22, 4294965248  ;;  %s432_s8 = sand.u32 1, %s1589_s14   ;;  %p2324_p3 = scmp.ne.s32.totalorder %s2292_s4, 0 }
  0xb1   : > { %s1086_s29 = sshll.u32 %s432_s8, 7  ;;  %s433_s13 = scalar_lea.sflag [#allocation11], %s432_s8 }
  0xb2   : > { %s2025_s0 = scalar_lea.vmem [#allocation10], %s1086_s29 }
  0xb3   : > { %1564 = dma.done.wait (%p2324_p3), %s433_s13, 2048  }
  0xb4   : > { %1566 = vsyncadd (%p2324_p3), %s433_s13, 4294965248  ;;  %s2325_s10 = sld [smem:[#allocation31_spill]]  ;;  %s2266_s15 = sand.u32 1, %s1577_s12  }
  0xb5   : > { %s2326_s26 = sld [smem:[#allocation30_spill]]  ;;  %s1087_s28 = sshll.u32 %s2266_s15, 5 }
  0xb6   : > { %s2327_s3 = sld [smem:[#allocation29_spill]] }
  0xb7   : > { %s2329_s6 = sld [smem:[#allocation42_spill]] }
  0xb8   : > { %s2331_s17 = sld [smem:[#allocation43_spill]] }
  0xba   : > { %s519_s18 = smul.u32 3, %s2325_s10  ;;  %s1088_s1 = sshll.u32 %s2325_s10, 2 }
  0xbb   : > { %p501_p12 = scmp.lt.s32.totalorder %s1088_s1, 15  ;;  %p558_p1 = scmp.eq.s32.totalorder %s2326_s26, 0 }
  0xbc   : > { %s2037_s9 = sadd.s32 %s2326_s26, %s519_s18  ;;  %p559_p5 = scmp.eq.s32.totalorder %s2327_s3, 0 }
  0xbd   : > { %s521_s4 = sld [smem:[#allocation5 + %s2037_s9]]  ;;  %s2389_s1 = smov (!%p501_p12, %s1088_s1), 15 }
  0xbe   : > { %s522_s25 = sld [smem:[#allocation6 + %s2037_s9]]  ;;  %p2044_p8 = pnand %p559_p5, %p558_p1 }
  0xbf   : > { %s550_s23 = sld [smem:[#allocation5 + %s2037_s9]]  ;;  %s1089_s2 = sshll.u32 %s2389_s1, 3 }
  0xc0   : > { %s2051_s19 = scalar_lea.vmem %s2329_s6, %s1089_s2  ;;  %s2330_s18 = sld [smem:[#allocation47_spill]] }
  0xc1   : > { %s2063_s7 = scalar_lea.vmem %s2331_s17, %s1089_s2 }
  0xc3   : > { %p526_p10 = scmp.lt.s32.totalorder %s521_s4, 2 }
  0xc4   : > { %s523_s22 = smul.u32 %s2327_s3, %s522_s25  ;;  %s524_s8 = ssub.s32 1, %s522_s25 }
  0xc5   : > { %s2391_s4 = smov (!%p526_p10, %s521_s4), 2  ;;  %p551_p2 = scmp.lt.s32.totalorder %s550_s23, 2 }
  0xc6   : > { %s525_s29 = sadd.s32 %s524_s8, %s523_s22  ;;  %s1092_s13 = sshll.u32 %s2391_s4, 1 }
  0xc7   : > { %p528_p6 = scmp.lt.s32.totalorder %s525_s29, 1  ;;  %s2393_s23 = smov (!%p551_p2, %s550_s23), 2 }
  0xc8   : > { %s553_s1 = scalar_lea.vmem %s2330_s18, %s2393_s23  ;;  %s2332_s22 = sld [smem:[#allocation45_spill]] }
  0xc9   : > { %s2395_s29 = smov (!%p528_p6, %s525_s29), 1  ;;  %s2071_s8 = scalar_lea.vmem [#allocation12], %s1087_s28 }
  0xca   : > { %s2065_s3 = sadd.s32 %s1092_s13, %s2395_s29  ;;  %563 = sbr.rel (%p2044_p8) target bundleno = 210 (0xd2), region = 56 }
  0xce   : > { %s532_s4 = scalar_lea.vmem %s2332_s22, %s2065_s3 }
  0xcf   : > { %v1642_v0 = vmov 0.0  }
  0xd0   : > { %564 = vst [vmem:[#allocation3] sm:$0xff] %v1642_v0  ;;  %565 = vst [vmem:[#allocation3 + $0x18] sm:$0xff] %v1642_v0 }
  0xd1   : > { %566 = vst [vmem:[#allocation3 + $0x8] sm:$0xff] %v1642_v0  ;;  %567 = vst [vmem:[#allocation3 + $0x10] sm:$0xff] %v1642_v0 }
  0xd2 PF: > { %s570_s27 = sld [smem:[#allocation6 + %s2037_s9]] }
  0xd8   : > { %p1093_p9 = scmp.eq.s32.totalorder %s570_s27, 0 }
  0xd9   : > { %s2333_s15 = sld [smem:[#allocation29_spill]] (!%p1093_p9) }
  0xda   : > { %574 = sbr.rel (%p1093_p9) target bundleno = 804 (0x324), region = 60 }
  0xdf   : > { %p1094_p0 = scmp.ne.s32.totalorder %s2333_s15, 0 }
  0xe1   : > { %577 = sbr.rel (%p1094_p0) target bundleno = 233 (0xe9), region = 64 }
  0xe6   : > { %v1643_v1 = vmov 0.0  }
  0xe7   : > { %578 = vst [vmem:[#allocation2 + $0x10] sm:$0xff] %v1643_v1  ;;  %579 = vst [vmem:[#allocation2] sm:$0xff] %v1643_v1 }
  0xe8   : > { %580 = vst [vmem:[#allocation2 + $0x18] sm:$0xff] %v1643_v1  ;;  %581 = vst [vmem:[#allocation2 + $0x8] sm:$0xff] %v1643_v1 }
  0xe9 PF: > { %v601_v2 = vld [vmem:[%s2018_s30 + $0x78] sm:$0xff]  ;;  %v600_v3 = vld [vmem:[%s2018_s30 + $0x70] sm:$0xff]  ;;  %v599_v4 = vld [vmem:[%s2018_s30 + $0x68] sm:$0xff] }
  0xea   : > { %1144 = vmatprep.subr.mxu0 %v601_v2  ;;  %v598_v5 = vld [vmem:[%s2018_s30 + $0x60] sm:$0xff]  ;;  %v597_v7 = vld [vmem:[%s2018_s30 + $0x58] sm:$0xff]  ;;  %v716_v9 = vld [vmem:[%s2025_s0 + $0x70] sm:$0xff] }
  0xeb   : > { %1145 = vmatpush3.msra.mxu0 %v601_v2  ;;  %v582_v6 = vld [vmem:[%s2051_s19] sm:$0xff]  ;;  %v717_v8 = vld [vmem:[%s2025_s0 + $0x78] sm:$0xff]  ;;  %v596_v10 = vld [vmem:[%s2018_s30 + $0x50] sm:$0xff] }
  0xec   : > { %1146 = vmatprep.subr.mxu0 %v600_v3  ;;  %1176 = vmatprep.mubr.f32.mxu0 %v582_v6  ;;  %v715_v11 = vld [vmem:[%s2025_s0 + $0x68] sm:$0xff]  ;;  %v714_v13 = vld [vmem:[%s2025_s0 + $0x60] sm:$0xff]  ;;  %v713_v15 = vld [vmem:[%s2025_s0 + $0x58] sm:$0xff] }
  0xed   : > { %1147 = vmatpush3.msra.mxu0 %v600_v3  ;;  %1182 = vmatprep.subr.mxu1 %v717_v8  ;;  %v595_v12 = vld [vmem:[%s2018_s30 + $0x48] sm:$0xff]  ;;  %v594_v14 = vld [vmem:[%s2018_s30 + $0x40] sm:$0xff]  ;;  %v593_v16 = vld [vmem:[%s2018_s30 + $0x38] sm:$0xff] }
  0xee   : > { %1148 = vmatprep.subr.mxu0 %v599_v4  ;;  %1183 = vmatpush3.msra.mxu1 %v717_v8  ;;  %v712_v17 = vld [vmem:[%s2025_s0 + $0x50] sm:$0xff]  ;;  %v711_v19 = vld [vmem:[%s2025_s0 + $0x48] sm:$0xff]  ;;  %v710_v21 = vld [vmem:[%s2025_s0 + $0x40] sm:$0xff] }
  0xef   : > { %1149 = vmatpush3.msra.mxu0 %v599_v4  ;;  %1184 = vmatprep.subr.mxu1 %v716_v9  ;;  %v592_v18 = vld [vmem:[%s2018_s30 + $0x30] sm:$0xff]  ;;  %v591_v20 = vld [vmem:[%s2018_s30 + $0x28] sm:$0xff]  ;;  %v590_v22 = vld [vmem:[%s2018_s30 + $0x20] sm:$0xff] }
  0xf0   : > { %1150 = vmatprep.subr.mxu0 %v598_v5  ;;  %1185 = vmatpush3.msra.mxu1 %v716_v9  ;;  %v709_v23 = vld [vmem:[%s2025_s0 + $0x38] sm:$0xff]  ;;  %v708_v25 = vld [vmem:[%s2025_s0 + $0x30] sm:$0xff]  ;;  %v707_v27 = vld [vmem:[%s2025_s0 + $0x28] sm:$0xff] }
  0xf1   : > { %1151 = vmatpush3.msra.mxu0 %v598_v5  ;;  %1186 = vmatprep.subr.mxu1 %v715_v11  ;;  %v589_v24 = vld [vmem:[%s2018_s30 + $0x18] sm:$0xff]  ;;  %v588_v26 = vld [vmem:[%s2018_s30 + $0x10] sm:$0xff]  ;;  %v587_v28 = vld [vmem:[%s2018_s30 + $0x8] sm:$0xff] }
  0xf2   : > { %1152 = vmatprep.subr.mxu0 %v597_v7  ;;  %1187 = vmatpush3.msra.mxu1 %v715_v11  ;;  %v706_v29 = vld [vmem:[%s2025_s0 + $0x20] sm:$0xff]  ;;  %v583_v31 = vld [vmem:[%s2051_s19 + $0x8] sm:$0xff]  ;;  %v584_v32 = vld [vmem:[%s2051_s19 + $0x10] sm:$0xff] }
  0xf3   : > { %1153 = vmatpush3.msra.mxu0 %v597_v7  ;;  %1188 = vmatprep.subr.mxu1 %v714_v13  ;;  %v586_v30 = vld [vmem:[%s2018_s30] sm:$0xff]  ;;  %v585_v33 = vld [vmem:[%s2051_s19 + $0x18] sm:$0xff]  ;;  %v704_v35 = vld [vmem:[%s2025_s0 + $0x10] sm:$0xff] }
  0xf4   : > { %1154 = vmatprep.subr.mxu0 %v596_v10  ;;  %1189 = vmatpush3.msra.mxu1 %v714_v13  ;;  %v705_v34 = vld [vmem:[%s2025_s0 + $0x18] sm:$0xff]  ;;  %v703_v36 = vld [vmem:[%s2025_s0 + $0x8] sm:$0xff]  ;;  %v702_v37 = vld [vmem:[%s2025_s0] sm:$0xff]  ;;  %s2335_s0 = sld [smem:[#allocation29_spill]] }
  0xf5   : > { %1155 = vmatpush3.msra.mxu0 %v596_v10  ;;  %1190 = vmatprep.subr.mxu1 %v713_v15  ;;  %v1095_v38 = vld [vmem:[%s532_s4] ss:$0 sm:$0xff]  ;;  %v698_v53 = vld [vmem:[#allocation2 + $0x10] sm:$0xff]  ;;  %v701_v56 = vld [vmem:[#allocation2 + $0x8] sm:$0xff] }
  0xf6   : > { %1156 = vmatprep.subr.mxu0 %v595_v12  ;;  %1191 = vmatpush3.msra.mxu1 %v713_v15  ;;  %v699_v51 = vld [vmem:[#allocation2] sm:$0xff]  ;;  %v700_v59 = vld [vmem:[#allocation2 + $0x18] sm:$0xff] }
  0xf7   : > { %1157 = vmatpush3.msra.mxu0 %v595_v12  ;;  %1192 = vmatprep.subr.mxu1 %v712_v17 }
  0xf8   : > { %1158 = vmatprep.subr.mxu0 %v594_v14  ;;  %1193 = vmatpush3.msra.mxu1 %v712_v17 }
  0xf9   : > { %1159 = vmatpush3.msra.mxu0 %v594_v14  ;;  %1194 = vmatprep.subr.mxu1 %v711_v19 }
  0xfa   : > { %1160 = vmatprep.subr.mxu0 %v593_v16  ;;  %1195 = vmatpush3.msra.mxu1 %v711_v19  ;;  %p1096_p11 = scmp.ne.s32.totalorder %s2335_s0, 1 }
  0xfb   : > { %1161 = vmatpush3.msra.mxu0 %v593_v16  ;;  %1196 = vmatprep.subr.mxu1 %v710_v21  ;;  %s815_s2 = sld [smem:[#allocation5 + %s2037_s9]] (!%p1096_p11) }
  0xfc   : > { %1162 = vmatprep.subr.mxu0 %v592_v18  ;;  %1197 = vmatpush3.msra.mxu1 %v710_v21 }
  0xfd   : > { %1163 = vmatpush3.msra.mxu0 %v592_v18  ;;  %1198 = vmatprep.subr.mxu1 %v709_v23 }
  0xfe   : > { %1164 = vmatprep.subr.mxu0 %v591_v20  ;;  %1199 = vmatpush3.msra.mxu1 %v709_v23 }
  0xff   : > { %1165 = vmatpush3.msra.mxu0 %v591_v20  ;;  %1200 = vmatprep.subr.mxu1 %v708_v25 }
 0x100   : > { %1166 = vmatprep.subr.mxu0 %v590_v22  ;;  %1201 = vmatpush3.msra.mxu1 %v708_v25 }
 0x101   : > { %1167 = vmatpush3.msra.mxu0 %v590_v22  ;;  %1202 = vmatprep.subr.mxu1 %v707_v27  ;;  %s820_s19 = sadd.s32 (!%p1096_p11), 1, %s815_s2 }
 0x102   : > { %1168 = vmatprep.subr.mxu0 %v589_v24  ;;  %1203 = vmatpush3.msra.mxu1 %v707_v27 }
 0x103   : > { %1169 = vmatpush3.msra.mxu0 %v589_v24  ;;  %1204 = vmatprep.subr.mxu1 %v706_v29 }
 0x104   : > { %1170 = vmatprep.subr.mxu0 %v588_v26  ;;  %1205 = vmatpush3.msra.mxu1 %v706_v29 }
 0x105   : > { %1171 = vmatpush3.msra.mxu0 %v588_v26  ;;  %1206 = vmatprep.subr.mxu1 %v705_v34 }
 0x106   : > { %1172 = vmatprep.subr.mxu0 %v587_v28  ;;  %1207 = vmatpush3.msra.mxu1 %v705_v34 }
 0x107   : > { %1173 = vmatpush3.msra.mxu0 %v587_v28  ;;  %1208 = vmatprep.subr.mxu1 %v704_v35 }
 0x108   : > { %1174 = vmatprep.subr.mxu0 %v586_v30  ;;  %1209 = vmatpush3.msra.mxu1 %v704_v35 }
 0x109   : > { %1175 = vmatpush3.msra.mxu0 %v586_v30  ;;  %1210 = vmatprep.subr.mxu1 %v703_v36 }
 0x10a   : > { %1177 = vmatmul.mubr.f32.vlgmr.msra.gmra.mxu0 %v583_v31  ;;  %1211 = vmatpush3.msra.mxu1 %v703_v36 }
 0x10b   : > { %1179 = vmatprep.mubr.f32.mxu0 %v584_v32  ;;  %1212 = vmatprep.subr.mxu1 %v702_v37 }
 0x10c   : > { %1213 = vmatpush3.msra.mxu1 %v702_v37 }
 0x10e   : > { %1180 = vmatmul.mubr.f32.gmra.mxu0 %v585_v33 }
 0x1ca   : > { %v1178_v39 = vpop.f32.mrf.mxu0 }
 0x1cb   : > { %v681_v40 = vadd.f32 %v1178_v39, %v1095_v38 }
 0x1cc   : > { %v675_v41 = vpop.f32.mrf.mxu0 }
 0x1cd   : > { %v676_v42 = vadd.f32 %v1095_v38, %v675_v41  ;;  %v695_v45 = vmax.f32 %v681_v40, 0.0 }
 0x1ce   : > { %v1181_v43 = vpop.f32.mrf.mxu0 }
 0x1cf   : > { %v694_v44 = vmax.f32 %v676_v42, 0.0  ;;  %v691_v46 = vadd.f32 %v1181_v43, %v1095_v38 }
 0x1d0   : > { %v685_v47 = vpop.f32.mrf.mxu0 }
 0x1d1   : > { %v686_v48 = vadd.f32 %v1095_v38, %v685_v47  ;;  %1214 = vmatprep.mubr.f32.mxu1 %v694_v44  ;;  %v697_v50 = vmax.f32 %v691_v46, 0.0 }
 0x1d2   : > { %1215 = vmatmul.mubr.f32.vlgmr.msra.gmra.mxu1 %v695_v45 }
 0x1d3   : > { %v696_v49 = vmax.f32 %v686_v48, 0.0 }
 0x1d5   : > { %1217 = vmatprep.mubr.f32.mxu1 %v696_v49 }
 0x1d6   : > { %1218 = vmatmul.mubr.f32.gmra.mxu1 %v697_v50 }
 0x292   : > { %v1216_v52 = vpop.f32.mrf.mxu1 }
 0x293   : > { %v804_v54 = vadd.f32 %v1216_v52, %v699_v51 }
 0x294   : > { %v784_v55 = vpop.f32.mrf.mxu1 }
 0x295   : > { %808 = vst [vmem:[#allocation2] sm:$0xff] %v804_v54  ;;  %v803_v57 = vadd.f32 %v784_v55, %v698_v53 }
 0x296   : > { %v1219_v58 = vpop.f32.mrf.mxu1 }
 0x297   : > { %807 = vst [vmem:[#allocation2 + $0x10] sm:$0xff] %v803_v57  ;;  %v806_v60 = vadd.f32 %v1219_v58, %v701_v56  ;;  %814 = sbr.rel (%p1096_p11) target bundleno = 804 (0x324), region = 68 }
 0x298   : > { %v794_v61 = vpop.f32.mrf.mxu1 }
 0x299   : > { %810 = vst [vmem:[#allocation2 + $0x8] sm:$0xff] %v806_v60  ;;  %v805_v62 = vadd.f32 %v794_v61, %v700_v59 }
 0x29b   : > { %809 = vst [vmem:[#allocation2 + $0x18] sm:$0xff] %v805_v62 }
 0x29c   : > { %v1644_v63 = vmov 0   ;;  %v818_v0 = vld [vmem:[%s2063_s7 + $0x10] sm:$0xff]  ;;  %v816_v1 = vld [vmem:[%s2063_s7] sm:$0xff]  ;;  %v819_v2 = vld [vmem:[%s2063_s7 + $0x18] sm:$0xff]  ;;  %v821_v4 = vstv %s820_s19 }
 0x29d   : > { %1394 = vset.pattern.permute.xlu1 %v1644_v63  ;;  %1393 = vset.pattern.permute.xlu0 %v1644_v63  ;;  %v817_v3 = vld [vmem:[%s2063_s7 + $0x8] sm:$0xff]  ;;  %vm824_vm0 = vcmp.eq.s32.totalorder %v818_v0, %v821_v4  ;;  %vm822_vm1 = vcmp.eq.s32.totalorder %v816_v1, %v821_v4  ;;  %vm825_vm2 = vcmp.eq.s32.totalorder %v819_v2, %v821_v4  ;;  %v1097_v10 = vld [vmem:[%s553_s1] ss:$0 sm:$0xff]  ;;  %v829_v26 = vld [vmem:[#allocation3 + $0x10] sm:$0xff] }
 0x29e   : > { %vm823_vm3 = vcmp.eq.s32.totalorder %v817_v3, %v821_v4  ;;  %v847_v5 = vsel %vm824_vm0, 1, %v1644_v63  ;;  %v845_v6 = vsel %vm822_vm1, 1, %v1644_v63  ;;  %v848_v7 = vsel %vm825_vm2, 1, %v1644_v63  ;;  %v830_v11 = vld [vmem:[#allocation2 + $0x10] sm:$0xff]  ;;  %v831_v15 = vld [vmem:[#allocation2] sm:$0xff]  ;;  %v828_v16 = vld [vmem:[#allocation3 + $0x8] sm:$0xff] }
 0x29f   : > { %856 = vperm.xlu1 %1394, %v847_v5   ;;  %850 = vperm.xlu0 %1393, %v845_v6   ;;  %v846_v8 = vsel %vm823_vm3, 1, %v1644_v63  ;;  %v841_v13 = vadd.f32 %v1097_v10, %v830_v11  ;;  %v826_v18 = vld [vmem:[#allocation3] sm:$0xff]  ;;  %v842_v23 = vadd.f32 %v1097_v10, %v831_v15  ;;  %v827_v28 = vld [vmem:[#allocation3 + $0x18] sm:$0xff] }
 0x2a0   : > { %v833_v14 = vld [vmem:[#allocation2 + $0x8] sm:$0xff] }
 0x2a1   : > { %v844_v22 = vadd.f32 %v1097_v10, %v833_v14 }
 0x2a2   : > { %v832_v9 = vld [vmem:[#allocation2 + $0x18] sm:$0xff] }
 0x2a3   : > { %859 = vperm.xlu1 %1394, %v848_v7   ;;  %853 = vperm.xlu0 %1393, %v846_v8   ;;  %v843_v12 = vadd.f32 %v1097_v10, %v832_v9 }
 0x31a   : > { %v857_v17 = vpop.permute.xlu1 %856  ;;  %v851_v19 = vpop.permute.xlu0 %850 }
 0x31b   : > { %vm863_vm4 = vcmp.eq.s32.totalorder %v857_v17, 1  ;;  %vm861_vm5 = vcmp.eq.s32.totalorder %v851_v19, 1 }
 0x31c   : > { %v867_v20 = vsel %vm863_vm4, %v843_v12, 0.0  ;;  %v865_v21 = vsel %vm861_vm5, %v841_v13, 0.0 }
 0x31d   : > { %v871_v24 = vadd.f32 %v867_v20, %v828_v16  ;;  %v869_v25 = vadd.f32 %v865_v21, %v826_v18 }
 0x31e   : > { %v860_v27 = vpop.permute.xlu1 %859  ;;  %v854_v29 = vpop.permute.xlu0 %853 }
 0x31f   : > { %875 = vst [vmem:[#allocation3 + $0x8] sm:$0xff] %v871_v24  ;;  %873 = vst [vmem:[#allocation3] sm:$0xff] %v869_v25  ;;  %vm864_vm6 = vcmp.eq.s32.totalorder %v860_v27, 1  ;;  %vm862_vm7 = vcmp.eq.s32.totalorder %v854_v29, 1 }
 0x320   : > { %v868_v30 = vsel %vm864_vm6, %v844_v22, 0.0  ;;  %v866_v31 = vsel %vm862_vm7, %v842_v23, 0.0 }
 0x321   : > { %v872_v32 = vadd.f32 %v868_v30, %v829_v26  ;;  %v870_v33 = vadd.f32 %v866_v31, %v827_v28 }
 0x323   : > { %876 = vst [vmem:[#allocation3 + $0x10] sm:$0xff] %v872_v32  ;;  %874 = vst [vmem:[#allocation3 + $0x18] sm:$0xff] %v870_v33 }
 0x324 PF: > { %s2337_s23 = sld [smem:[#allocation30_spill]] }
 0x325   : > { %s2338_s10 = sld [smem:[#allocation29_spill]] }
 0x32a   : > { %p877_p4 = scmp.eq.s32.totalorder %s2337_s23, 2 }
 0x32b   : > { %p878_p7 = scmp.eq.s32.totalorder %s2338_s10, 1 }
 0x32d   : > { %p879_p13 = pnand %p878_p7, %p877_p4 }
 0x32f   : > { %882 = sbr.rel (%p879_p13) target bundleno = 823 (0x337), region = 72 }
 0x334   : > { %v883_v34 = vld [vmem:[#allocation3] sm:$0xff]  ;;  %v884_v35 = vld [vmem:[#allocation3 + $0x18] sm:$0xff]  ;;  %v885_v36 = vld [vmem:[#allocation3 + $0x8] sm:$0xff] }
 0x335   : > { %887 = vst [vmem:[%s2071_s8] sm:$0xff] %v883_v34  ;;  %888 = vst [vmem:[%s2071_s8 + $0x8] sm:$0xff] %v884_v35  ;;  %v886_v37 = vld [vmem:[#allocation3 + $0x10] sm:$0xff] }
 0x336   : > { %889 = vst [vmem:[%s2071_s8 + $0x10] sm:$0xff] %v885_v36  ;;  %890 = vst [vmem:[%s2071_s8 + $0x18] sm:$0xff] %v886_v37 }
 0x337 PF: > { %s2339_s26 = sld [smem:[#allocation31_spill]]  ;;  %s905_s25 = sshll.u32 %s2071_s8, 4  ;;  %s2142_s25 = int_to_ptr.vmem [resolvable:$true] %s905_s25 }
 0x338   : > { %s2340_s7 = sld [smem:[#allocation48_spill]]  ;;  %s2341_s6 = sand.u32 1, %s1577_s12  }
 0x339   : > { %s2146_s22 = scalar_lea.sflag [#allocation9], %s2341_s6  ;;  %s1467_s4 = scalar_lea.vmem %s2142_s25, 512 }
 0x33a   : > { %p1468_p3 = scmp.ne.s32.totalorder %s2142_s25, %s1467_s4  ;;  %p2342_p12 = scmp.ne.s32.totalorder %s2298_s20, 0 }
 0x33b   : > { %s1645_s27 = smov [#allocation12]  }
 0x33c   : > { %p1469_p1 = pnand %p1468_p3, %p2342_p12  ;;  %s1471_s15 = sshll.u32 %s1645_s27, 4  ;;  %s1472_s15 = int_to_ptr.vmem [resolvable:$false] %s1471_s15 }
 0x33d   : > { %s1103_s18 = sshll.u32 %s2339_s26, 9  ;;  %s1473_s30 = scalar_lea.vmem %s1472_s15, 1024 }
 0x33e   : > { %s2139_s3 = scalar_lea.hbm %s2340_s7, %s1103_s18  ;;  %p1470_p5 = pneg %p1469_p1 }
 0x33f   : > { %p1474_p8 = scmp.lt.s32.totalorder %s2142_s25, %s1472_s15  ;;  %p1475_p10 = scmp.lt.s32.totalorder %s1473_s30, %s1467_s4 }
 0x341   : > { %p1476_p2 = por %p1475_p10, %p1474_p8 }
 0x343   : > { %p1477_p6 = pnand %p1476_p2, %p1470_p5 }
 0x345   : > { %1480 = shalt.err (!%p1477_p6)
}
 0x346   : > { %s1481_s8 = scalar_lea.hbm %s2139_s3, 512  ;;  %s1485_s0 = scalar_lea.hbm %s2340_s7, 2048 }
 0x347   : > { %p1482_p9 = scmp.ne.s32.totalorder %s2139_s3, %s1481_s8  ;;  %p1486_p4 = scmp.lt.s32.totalorder %s2139_s3, %s2340_s7 }
 0x348   : > { %p1487_p7 = scmp.lt.s32.totalorder %s1485_s0, %s1481_s8 }
 0x349   : > { %p1483_p0 = pnand %p1482_p9, %p2342_p12 }
 0x34a   : > { %p1488_p13 = por %p1487_p7, %p1486_p4 }
 0x34b   : > { %p1484_p11 = pneg %p1483_p0 }
 0x34d   : > { %p1489_p3 = pnand %p1488_p13, %p1484_p11 }
 0x34f   : > { %1492 = shalt.err (!%p1489_p3)
}
 0x350   : > { %s1646_s9 = smov 128   ;;  %s1647_s29 = smov 8  }
 0x351   : > { %1232 = dma.vmem_to_hbm [thread:$0]  (%p2342_p12), %s2142_s25, 512, %s2139_s3, %s2146_s22, %s1646_s9, %s1646_s9, %s1647_s29  }
 0x352 PF: > { %p1254_p1 = scmp.ge.s32.totalorder %s1633_s24, 2  ;;  %s920_s13 = sand.u32 1, %s1573_s11  }
 0x353   : > { %p2343_p5 = scmp.ne.s32.totalorder %s2303_s5, 0  ;;  %s921_s23 = scalar_lea.sflag [#allocation9], %s920_s13 }
 0x355   : > { %p1250_p8 = pnand %p1254_p1, %p2343_p5 }
 0x357   : > { %p1251_p10 = pneg %p1250_p8 }
 0x359   : > { %1568 = dma.done.wait (%p1251_p10), %s921_s23, 512  }
 0x35a   : > { %1570 = vsyncadd (%p1251_p10), %s921_s23, 4294966784  ;;  %s33_s24 = sadd.s32 1, %s1633_s24   ;;  %s2345_s20 = sld [smem:[#allocation25_spill]] }
 0x35b   : > { %p2174_p2 = scmp.ge.s32.totalorder %s33_s24, 26   ;;  %s2346_s13 = sld [smem:[#allocation40_spill]] }
 0x35c   : > { %s2347_s26 = sld [smem:[#allocation26_spill]]  ;;  %s2357_s11 = smov %s1577_s12 }
 0x35d   : > { %s2348_s1 = sld [smem:[#allocation41_spill]]  ;;  %s2359_s0 = smov %s1589_s14 }
 0x35e   : > { %s2349_s15 = sld [smem:[#allocation27_spill]]  ;;  %s2361_s18 = smov %s1621_s21 }
 0x35f   : > { %s2350_s16 = sld [smem:[#allocation28_spill]] }
 0x360   : > { %s2351_s17 = sld [smem:[#allocation39_spill]]  ;;  %s2358_s12 = smov %s2345_s20 }
 0x361   : > { %s2352_s19 = sld [smem:[#allocation32_spill]] }
 0x362   : > { %s2353_s5 = sld [smem:[#allocation33_spill]]  ;;  %s2360_s14 = smov %s2347_s26 }
 0x363   : > { %s2354_s3 = sld [smem:[#allocation34_spill]] }
 0x364   : > { %s2355_s22 = sld [smem:[#allocation36_spill]] }
 0x365   : > { %s2356_s23 = sld [smem:[#allocation37_spill]]  ;;  %32 = sbr.rel (!%p2174_p2) target bundleno = 26 (0x1a), region = 134 }
 0x368   : > { %s2362_s20 = smov %s2353_s5 }
 0x369   : > { %s2363_s21 = smov %s2354_s3 }
 0x36a   :  { %926 = vsyncpa [#allocation8], 1 }
 0x36b   :  { %928 = vsyncpa [#allocation8 + $0x1], 1 }
 0x36c   :  { %929 = vsyncpa [#allocation11], 1 }
 0x36d   :  { %931 = vsyncpa [#allocation11 + $0x1], 1 }
 0x36e   :  { %932 = vsyncpa [#allocation9], 1 }
 0x36f   :  { %934 = vsyncpa [#allocation9 + $0x1], 1 }

</bundles_post_ra>
